<compile_context>
chip_gen: v7x
topology: tpu7x:2x2x1
jax: 0.10.0
libtpu: 0.0.40
codegen_flags: <defaults>
</compile_context>

<pallas_src>
import functools

import jax
import jax.numpy as jnp
from jax.experimental import pallas as pl
from jax.experimental.pallas import tpu as pltpu

LANE = 128
_VMEM_LIMIT = 32 * 1024 * 1024  # raise v5e's 16 MiB scoped default; tiles stay a few MB


def _round_up(x, m):
    return (x + m - 1) // m * m


# ----------------------------- Pallas kernels ------------------------------

def _conv1_pool_kernel(col2_ref, colp_ref, w_ref, b_ref, o_ref, shifted_ref,
                       *, wo, wp, c0p):
    """conv1 (3x3, s2, p1) + folded-BN + ReLU fused with maxpool (3x3, s2, p1).

    col2_ref: (1, 2*wo, K)  im2col rows of conv rows 2*hp and 2*hp+1
    colp_ref: (1, wo, K)    im2col rows of conv row 2*hp-1 (index clamped at hp==0)
    w_ref:    (K, C0p)      conv1 weight, BN scale folded, bf16
    b_ref:    (1, C0p)      BN shift, f32
    o_ref:    (1, 1, wp, C0p) pooled output row, bf16
    """
    hp = pl.program_id(1)
    w = w_ref[...]
    b = b_ref[...]

    a = jnp.dot(col2_ref[0], w, preferred_element_type=jnp.float32) + b
    a = jnp.maximum(a, 0.0)                                   # conv rows 2hp, 2hp+1
    p = jnp.dot(colp_ref[0], w, preferred_element_type=jnp.float32) + b
    p = jnp.maximum(p, 0.0)                                   # conv row 2hp-1
    # Top edge: the pool padding row contributes 0, which is equivalent to -inf
    # here because every ReLU output is >= 0.
    p = p * (hp > 0).astype(jnp.float32)

    rowmax = jnp.maximum(p, jnp.maximum(a[:wo, :], a[wo:, :]))  # (wo, C0p)
    even = rowmax[:wp, :]        # conv cols 2*wp     (positions pre-ordered even|odd)
    odd = rowmax[wp:, :]         # conv cols 2*wp + 1
    # odd shifted down one row with a zero on top == conv cols 2*wp - 1
    shifted_ref[0:1, :] = jnp.zeros((1, c0p), jnp.float32)
    shifted_ref[1:wp, :] = odd[:wp - 1, :]
    pooled = jnp.maximum(jnp.maximum(even, odd), shifted_ref[...])
    o_ref[0, 0] = pooled.astype(o_ref.dtype)


def _pointwise_chain_mean_kernel(x_ref, w2_ref, b2_ref, wl_ref, bl_ref,
                                 w3_ref, b3_ref, w4_ref, b4_ref, w5_ref, b5_ref,
                                 feat_ref, acc_ref, *, hw, tile_m):
    """stage2+local -> add -> stage3 -> stage4 -> conv5 -> spatial mean, fused."""
    mt = pl.program_id(1)

    @pl.when(mt == 0)
    def _():
        acc_ref[...] = jnp.zeros_like(acc_ref)

    def mm_relu(h, w_r, b_r):
        y = jnp.dot(h, w_r[...], preferred_element_type=jnp.float32) + b_r[...]
        return jnp.maximum(y, 0.0)        # epilogue kept in f32 (v5e VPU has no bf16)

    x = x_ref[0]                                              # (tile_m, C0p) bf16
    s2 = mm_relu(x, w2_ref, b2_ref)                           # stage2 (stand-in)
    loc = mm_relu(x, wl_ref, bl_ref)                          # local  (stand-in)
    # TODO(synk): Modulator is undefined in the reference -> identity stand-in.
    h = (s2 + loc).astype(jnp.bfloat16)
    h = mm_relu(h, w3_ref, b3_ref).astype(jnp.bfloat16)       # stage3 (stand-in)
    h = mm_relu(h, w4_ref, b4_ref).astype(jnp.bfloat16)       # stage4 (stand-in)
    h5 = mm_relu(h, w5_ref, b5_ref)                           # conv5: (tile_m, C4p) f32

    # x.mean([2, 3]): accumulate masked partial sums (rows >= hw are tile padding).
    row = mt * tile_m + jax.lax.broadcasted_iota(jnp.int32, (tile_m, 1), 0)
    valid = (row < hw).astype(jnp.float32)
    acc_ref[...] += jnp.sum(h5 * valid, axis=0, keepdims=True)

    @pl.when(mt == pl.num_programs(1) - 1)
    def _():
        feat_ref[0] = acc_ref[...] * (1.0 / hw)


def _batch_max_kernel(x_ref, o_ref):
    # torch.max(x, dim=0, keepdim=True)[0]
    o_ref[...] = jnp.max(x_ref[...], axis=0, keepdims=True)


# ------------------------------ op wrappers ---------------------------------

def conv1_maxpool(col, w_mat, shift, *, n, wo, hp, wp, c0p):
    k = col.shape[-1]
    kernel = functools.partial(_conv1_pool_kernel, wo=wo, wp=wp, c0p=c0p)
    return pl.pallas_call(
        kernel,
        out_shape=jax.ShapeDtypeStruct((n, hp, wp, c0p), jnp.bfloat16),
        grid=(n, hp),
        in_specs=[
            pl.BlockSpec((1, 2 * wo, k), lambda i, j: (i, j, 0)),
            pl.BlockSpec((1, wo, k), lambda i, j: (i, jnp.maximum(2 * j - 1, 0), 0)),
            pl.BlockSpec(w_mat.shape, lambda i, j: (0, 0)),      # VMEM-resident weight
            pl.BlockSpec(shift.shape, lambda i, j: (0, 0)),
        ],
        out_specs=pl.BlockSpec((1, 1, wp, c0p), lambda i, j: (i, j, 0, 0)),
        scratch_shapes=[pltpu.VMEM((wp, c0p), jnp.float32)],
        compiler_params=pltpu.CompilerParams(
            dimension_semantics=("parallel", "parallel"),
            vmem_limit_bytes=_VMEM_LIMIT),
    )(col, col, w_mat, shift)


def pointwise_chain_and_mean(y, packed, *, hw, tile_m):
    n, mp, c0p = y.shape
    w2, b2 = packed["stage2"]
    wl, bl = packed["local"]
    w3, b3 = packed["stage3"]
    w4, b4 = packed["stage4"]
    w5, b5 = packed["conv5"]
    c4p = w5.shape[1]

    def const_spec(arr):
        return pl.BlockSpec(arr.shape, lambda i, j, nd=arr.ndim: (0,) * nd)

    kernel = functools.partial(_pointwise_chain_mean_kernel, hw=hw, tile_m=tile_m)
    feats = pl.pallas_call(
        kernel,
        out_shape=jax.ShapeDtypeStruct((n, 1, c4p), jnp.float32),
        grid=(n, mp // tile_m),
        in_specs=[pl.BlockSpec((1, tile_m, c0p), lambda i, j: (i, j, 0)),
                  const_spec(w2), const_spec(b2),
                  const_spec(wl), const_spec(bl),
                  const_spec(w3), const_spec(b3),
                  const_spec(w4), const_spec(b4),
                  const_spec(w5), const_spec(b5)],
        out_specs=pl.BlockSpec((1, 1, c4p), lambda i, j: (i, 0, 0)),
        scratch_shapes=[pltpu.VMEM((1, c4p), jnp.float32)],
        compiler_params=pltpu.CompilerParams(
            dimension_semantics=("parallel", "arbitrary"),
            vmem_limit_bytes=_VMEM_LIMIT),
    )(y, w2, b2, wl, bl, w3, b3, w4, b4, w5, b5)
    return feats.reshape(n, c4p)


def batch_max_keepdim(feats):
    n, c = feats.shape
    return pl.pallas_call(
        _batch_max_kernel,
        out_shape=jax.ShapeDtypeStruct((1, c), jnp.float32),
        grid=(1,),
        in_specs=[pl.BlockSpec((n, c), lambda i: (0, 0))],
        out_specs=pl.BlockSpec((1, c), lambda i: (0, 0)),
    )(feats)


# ------------------------- parameters (PyTorch-style) ------------------------

def _fold_bn(gamma, beta, mean, var, eps=1e-5):
    scale = gamma / jnp.sqrt(var + eps)
    shift = beta - mean * scale
    return scale, shift


def _init_conv_bn(key, cin, cout, ksize):
    k = jax.random.split(key, 5)
    return {
        "w": jax.random.normal(k[0], (cout, cin, ksize, ksize), jnp.float32) * 0.1,
        "gamma": jax.random.uniform(k[1], (cout,), jnp.float32, 0.5, 1.5),
        "beta": jax.random.normal(k[2], (cout,), jnp.float32) * 0.1,
        "mean": jax.random.normal(k[3], (cout,), jnp.float32) * 0.1,
        "var": jax.random.uniform(k[4], (cout,), jnp.float32, 0.5, 1.5),
    }


def init_efficient_face_params(key, stages_out_channels):
    c0, c1, c2, c3, c4 = stages_out_channels
    keys = jax.random.split(key, 6)
    return {
        "conv1": _init_conv_bn(keys[0], 3, c0, 3),
        # TODO(synk): stand-ins -- InvertedResidual / LocalFeatureExtractor bodies
        # are not defined in the provided reference source.
        "stage2": _init_conv_bn(keys[1], c0, c1, 1),
        "local": _init_conv_bn(keys[2], c0, c1, 1),
        "stage3": _init_conv_bn(keys[3], c1, c2, 1),
        "stage4": _init_conv_bn(keys[4], c2, c3, 1),
        "conv5": _init_conv_bn(keys[5], c3, c4, 1),
    }


def _pack_conv_bn(p, kpad, cout_pad):
    """BN scale folded into the weight columns, shift kept as an f32 bias; weights
    in (K, Cout) matmul layout, zero-padded to lane/sublane friendly sizes, bf16."""
    w = p["w"]
    cout, cin, kh, kw = w.shape
    scale, shift = _fold_bn(p["gamma"], p["beta"], p["mean"], p["var"])
    if kh == 1:
        wm = w[:, :, 0, 0].T                                        # (Cin, Cout)
        k = cin
    else:
        wm = jnp.transpose(w, (2, 3, 1, 0)).reshape(kh * kw * cin, cout)
        k = kh * kw * cin
    wm = wm * scale[None, :]
    wm = jnp.pad(wm, ((0, kpad - k), (0, cout_pad - cout))).astype(jnp.bfloat16)
    b = jnp.pad(shift, (0, cout_pad - cout)).reshape(1, cout_pad).astype(jnp.float32)
    return wm, b


def pack_params_for_kernels(raw, stages_out_channels):
    c0, c1, c2, c3, c4 = stages_out_channels
    c0p, c1p, c2p, c3p, c4p = (_round_up(c, LANE) for c in (c0, c1, c2, c3, c4))
    return {
        "conv1": _pack_conv_bn(raw["conv1"], _round_up(9 * 3, 32), c0p),  # K: 27 -> 32
        "stage2": _pack_conv_bn(raw["stage2"], c0p, c1p),
        "local": _pack_conv_bn(raw["local"], c0p, c1p),
        "stage3": _pack_conv_bn(raw["stage3"], c1p, c2p),
        "stage4": _pack_conv_bn(raw["stage4"], c2p, c3p),
        "conv5": _pack_conv_bn(raw["conv5"], c3p, c4p),
    }


# --------------------------------- forward ----------------------------------

def _build_conv1_cols(x, ho, wo, kpad):
    """3x3 / stride-2 / pad-1 im2col patches, bf16, K padded to a sublane multiple.

    Built once by XLA (a few x the tiny 3-channel input); the heavyweight tensors
    (conv1 activation, the old 9x maxpool patches) never hit HBM thanks to the
    fused conv1+maxpool kernel.  Within each conv row the positions are reordered
    [even wo | odd wo] so the kernel's stride-2 column pooling is unit-stride.
    """
    n, _, _, cin = x.shape
    xp = jnp.pad(x, ((0, 0), (1, 1), (1, 1), (0, 0)))
    taps = [xp[:, kh:kh + 2 * ho:2, kw:kw + 2 * wo:2, :]
            for kh in range(3) for kw in range(3)]
    col = jnp.stack(taps, axis=3).reshape(n, ho, wo, 9 * cin)
    col = jnp.concatenate([col[:, :, 0::2, :], col[:, :, 1::2, :]], axis=2)
    col = col.reshape(n, ho * wo, 9 * cin)
    col = jnp.pad(col, ((0, 0), (0, 0), (0, kpad - 9 * cin)))
    return col.astype(jnp.bfloat16)


def efficient_face_temporal_forward(packed, x_nchw, stages_out_channels):
    c4 = stages_out_channels[-1]
    c0p = _round_up(stages_out_channels[0], LANE)

    x = jnp.transpose(x_nchw, (0, 2, 3, 1))          # NCHW (PyTorch) -> NHWC
    n, h, w, _ = x.shape
    ho = (h - 1) // 2 + 1                            # conv1 output (k=3, s=2, p=1)
    wo = (w - 1) // 2 + 1
    hp = (ho - 1) // 2 + 1                           # maxpool output (k=3, s=2, p=1)
    wp = (wo - 1) // 2 + 1
    # TODO(synk): the fused conv1+maxpool kernel assumes an even conv1 height and a
    # sublane-aligned conv1 width (holds for the 224x224 EfficientFace input).
    assert ho % 2 == 0 and wo % 8 == 0, (ho, wo)

    # conv1 + BN + ReLU + maxpool, fused
    w1, b1 = packed["conv1"]
    col = _build_conv1_cols(x, ho, wo, w1.shape[0])
    pooled = conv1_maxpool(col, w1, b1, n=n, wo=wo, hp=hp, wp=wp, c0p=c0p)

    # modulator(stage2) + local -> stage3 -> stage4 -> conv5 -> mean([2, 3]), fused
    hw = hp * wp
    tile_m = min(512, _round_up(hw, 8))
    mp = _round_up(hw, tile_m)
    y = pooled.reshape(n, hw, c0p)
    if mp != hw:
        y = jnp.pad(y, ((0, 0), (0, mp - hw), (0, 0)))
    feats = pointwise_chain_and_mean(y, packed, hw=hw, tile_m=tile_m)    # (N, C4p)

    # forward(): max over the batch dimension, keepdim
    out = batch_max_keepdim(feats)                                       # (1, C4p)
    return out[:, :c4]


if __name__ == "__main__":
    key = jax.random.PRNGKey(0)
    k_param, k_x = jax.random.split(key)

    stages_repeats = [1, 1, 1]                        # small synthetic config
    stages_out_channels = (8, 16, 32, 64, 64)

    raw = init_efficient_face_params(k_param, stages_out_channels)
    packed = pack_params_for_kernels(raw, stages_out_channels)
    x = jax.random.normal(k_x, (2, 3, 16, 16), jnp.float32)   # NCHW, like PyTorch

    fwd = jax.jit(functools.partial(efficient_face_temporal_forward,
                                    stages_out_channels=stages_out_channels))
    out = jax.block_until_ready(fwd(packed, x))
    assert out.shape == (1, stages_out_channels[-1]), out.shape
    assert bool(jnp.all(jnp.isfinite(out)))
    print("KERNEL_OK")
</pallas_src>

<mosaic_0001>
module attributes {stable_mosaic.version = 11 : i64} {
  func.func @_conv1_pool_kernel(%arg0: i32, %arg1: i32, %arg2: memref<1x16x32xbf16, #tpu.memory_space<vmem>>, %arg3: memref<1x8x32xbf16, #tpu.memory_space<vmem>>, %arg4: memref<32x128xbf16, #tpu.memory_space<vmem>>, %arg5: memref<1x128xf32, #tpu.memory_space<vmem>>, %arg6: memref<1x1x4x128xbf16, #tpu.memory_space<vmem>>, %arg7: memref<4x128xf32, #tpu.memory_space<vmem>>) attributes {dimension_semantics = [#tpu.dimension_semantics<parallel>, #tpu.dimension_semantics<parallel>], iteration_bounds = array<i64: 2, 4>, scalar_prefetch = 0 : i64, scratch_operands = 1 : i64, tpu.core_type = #tpu.core_type<tc>, window_params = [{transform_indices = @transform_0, window_bounds = array<i64: 1, 16, 32>}, {transform_indices = @transform_1, window_bounds = array<i64: 1, 8, 32>}, {pipeline_mode = #tpu.pipeline_mode<synchronous>, transform_indices = @transform_2, window_bounds = array<i64: 32, 128>}, {pipeline_mode = #tpu.pipeline_mode<synchronous>, transform_indices = @transform_3, window_bounds = array<i64: 1, 128>}, {transform_indices = @transform_4, window_bounds = array<i64: 1, 1, 4, 128>}]} {
    %c0 = arith.constant 0 : index
    %c0_0 = arith.constant 0 : index
    %0 = vector.load %arg4[%c0, %c0_0] : memref<32x128xbf16, #tpu.memory_space<vmem>>, vector<32x128xbf16>
    %c0_1 = arith.constant 0 : index
    %c0_2 = arith.constant 0 : index
    %1 = vector.load %arg5[%c0_1, %c0_2] : memref<1x128xf32, #tpu.memory_space<vmem>>, vector<1x128xf32>
    %c0_3 = arith.constant 0 : index
    %c0_4 = arith.constant 0 : index
    %c0_5 = arith.constant 0 : index
    %2 = vector.load %arg2[%c0_3, %c0_4, %c0_5] : memref<1x16x32xbf16, #tpu.memory_space<vmem>>, vector<1x16x32xbf16>
    %3 = vector.shape_cast %2 : vector<1x16x32xbf16> to vector<16x32xbf16>
    %cst = arith.constant dense<0.000000e+00> : vector<16x128xf32>
    %4 = tpu.matmul %3, %0, %cst {dimension_numbers = #tpu.dot_dimension_numbers<[1], [0], [0], [1], [0, 0, 1, 1], [], []>} : vector<16x32xbf16>, vector<32x128xbf16>, vector<16x128xf32> -> vector<16x128xf32>
    %5 = vector.broadcast %1 : vector<1x128xf32> to vector<16x128xf32>
    %6 = arith.addf %4, %5 : vector<16x128xf32>
    %cst_6 = arith.constant 0.000000e+00 : f32
    %7 = vector.broadcast %cst_6 : f32 to vector<16x128xf32>
    %8 = arith.maximumf %6, %7 : vector<16x128xf32>
    %c0_7 = arith.constant 0 : index
    %c0_8 = arith.constant 0 : index
    %c0_9 = arith.constant 0 : index
    %9 = vector.load %arg3[%c0_7, %c0_8, %c0_9] : memref<1x8x32xbf16, #tpu.memory_space<vmem>>, vector<1x8x32xbf16>
    %10 = vector.shape_cast %9 : vector<1x8x32xbf16> to vector<8x32xbf16>
    %cst_10 = arith.constant dense<0.000000e+00> : vector<8x128xf32>
    %11 = tpu.matmul %10, %0, %cst_10 {dimension_numbers = #tpu.dot_dimension_numbers<[1], [0], [0], [1], [0, 0, 1, 1], [], []>} : vector<8x32xbf16>, vector<32x128xbf16>, vector<8x128xf32> -> vector<8x128xf32>
    %12 = vector.broadcast %1 : vector<1x128xf32> to vector<8x128xf32>
    %13 = arith.addf %11, %12 : vector<8x128xf32>
    %cst_11 = arith.constant 0.000000e+00 : f32
    %14 = vector.broadcast %cst_11 : f32 to vector<8x128xf32>
    %15 = arith.maximumf %13, %14 : vector<8x128xf32>
    %c0_i32 = arith.constant 0 : i32
    %16 = arith.cmpi sgt, %arg1, %c0_i32 : i32
    %17 = arith.extui %16 : i1 to i32
    %18 = arith.sitofp %17 : i32 to f32
    %19 = vector.broadcast %18 : f32 to vector<8x128xf32>
    %20 = arith.mulf %15, %19 : vector<8x128xf32>
    %21 = vector.extract_strided_slice %8 {offsets = [0, 0], sizes = [8, 128], strides = [1, 1]} : vector<16x128xf32> to vector<8x128xf32>
    %22 = vector.extract_strided_slice %8 {offsets = [8, 0], sizes = [8, 128], strides = [1, 1]} : vector<16x128xf32> to vector<8x128xf32>
    %23 = arith.maximumf %21, %22 : vector<8x128xf32>
    %24 = arith.maximumf %20, %23 : vector<8x128xf32>
    %25 = vector.extract_strided_slice %24 {offsets = [0, 0], sizes = [4, 128], strides = [1, 1]} : vector<8x128xf32> to vector<4x128xf32>
    %26 = vector.extract_strided_slice %24 {offsets = [4, 0], sizes = [4, 128], strides = [1, 1]} : vector<8x128xf32> to vector<4x128xf32>
    %cst_12 = arith.constant 0.000000e+00 : f32
    %27 = vector.broadcast %cst_12 : f32 to vector<1x128xf32>
    %c0_13 = arith.constant 0 : index
    %c0_14 = arith.constant 0 : index
    %28 = vector.load %arg7[%c0_13, %c0_14] : memref<4x128xf32, #tpu.memory_space<vmem>>, vector<1x128xf32>
    tpu.vector_store %arg7[%c0_13, %c0_14], %27 {strides = array<i32>} : memref<4x128xf32, #tpu.memory_space<vmem>>, vector<1x128xf32>,
    %29 = vector.extract_strided_slice %26 {offsets = [0, 0], sizes = [3, 128], strides = [1, 1]} : vector<4x128xf32> to vector<3x128xf32>
    %c1 = arith.constant 1 : index
    %c0_15 = arith.constant 0 : index
    %30 = vector.load %arg7[%c1, %c0_15] : memref<4x128xf32, #tpu.memory_space<vmem>>, vector<3x128xf32>
    tpu.vector_store %arg7[%c1, %c0_15], %29 {strides = array<i32>} : memref<4x128xf32, #tpu.memory_space<vmem>>, vector<3x128xf32>,
    %31 = arith.maximumf %25, %26 : vector<4x128xf32>
    %c0_16 = arith.constant 0 : index
    %c0_17 = arith.constant 0 : index
    %32 = vector.load %arg7[%c0_16, %c0_17] : memref<4x128xf32, #tpu.memory_space<vmem>>, vector<4x128xf32>
    %33 = arith.maximumf %31, %32 : vector<4x128xf32>
    %34 = arith.truncf %33 : vector<4x128xf32> to vector<4x128xbf16>
    %c0_18 = arith.constant 0 : index
    %c0_19 = arith.constant 0 : index
    %c0_20 = arith.constant 0 : index
    %c0_21 = arith.constant 0 : index
    %35 = vector.load %arg6[%c0_18, %c0_19, %c0_20, %c0_21] : memref<1x1x4x128xbf16, #tpu.memory_space<vmem>>, vector<1x1x4x128xbf16>
    %36 = vector.shape_cast %35 : vector<1x1x4x128xbf16> to vector<4x128xbf16>
    %37 = vector.shape_cast %34 : vector<4x128xbf16> to vector<1x1x4x128xbf16>
    tpu.vector_store %arg6[%c0_18, %c0_19, %c0_20, %c0_21], %37 {strides = array<i32>} : memref<1x1x4x128xbf16, #tpu.memory_space<vmem>>, vector<1x1x4x128xbf16>,
    return
  }
  func.func @transform_0(%arg0: i32, %arg1: i32) -> (i32, i32, i32) {
    %c0_i32 = arith.constant 0 : i32
    %c0_i32_0 = arith.constant 0 : i32
    return %arg0, %arg1, %c0_i32 : i32, i32, i32
  }
  func.func @transform_1(%arg0: i32, %arg1: i32) -> (i32, i32, i32) {
    %c2_i32 = arith.constant 2 : i32
    %0 = arith.muli %c2_i32, %arg1 : i32
    %c1_i32 = arith.constant 1 : i32
    %1 = arith.subi %0, %c1_i32 : i32
    %c0_i32 = arith.constant 0 : i32
    %2 = arith.maxsi %1, %c0_i32 : i32
    %c0_i32_0 = arith.constant 0 : i32
    %c0_i32_1 = arith.constant 0 : i32
    return %arg0, %2, %c0_i32_0 : i32, i32, i32
  }
  func.func @transform_2(%arg0: i32, %arg1: i32) -> (i32, i32) {
    %c0_i32 = arith.constant 0 : i32
    %c0_i32_0 = arith.constant 0 : i32
    %c0_i32_1 = arith.constant 0 : i32
    return %c0_i32, %c0_i32_0 : i32, i32
  }
  func.func @transform_3(%arg0: i32, %arg1: i32) -> (i32, i32) {
    %c0_i32 = arith.constant 0 : i32
    %c0_i32_0 = arith.constant 0 : i32
    %c0_i32_1 = arith.constant 0 : i32
    return %c0_i32, %c0_i32_0 : i32, i32
  }
  func.func @transform_4(%arg0: i32, %arg1: i32) -> (i32, i32, i32, i32) {
    %c0_i32 = arith.constant 0 : i32
    %c0_i32_0 = arith.constant 0 : i32
    %c0_i32_1 = arith.constant 0 : i32
    return %arg0, %arg1, %c0_i32, %c0_i32_0 : i32, i32, i32, i32
  }
}

module attributes {stable_mosaic.version = 11 : i64} {
  func.func @_batch_max_kernel(%arg0: i32, %arg1: memref<2x128xf32, #tpu.memory_space<vmem>>, %arg2: memref<1x128xf32, #tpu.memory_space<vmem>>) attributes {dimension_semantics = [#tpu.dimension_semantics<arbitrary>], iteration_bounds = array<i64: 1>, scalar_prefetch = 0 : i64, scratch_operands = 0 : i64, tpu.core_type = #tpu.core_type<tc>, window_params = [{pipeline_mode = #tpu.pipeline_mode<synchronous>, transform_indices = @transform_0, window_bounds = array<i64: 2, 128>}, {pipeline_mode = #tpu.pipeline_mode<synchronous>, transform_indices = @transform_1, window_bounds = array<i64: 1, 128>}]} {
    %c0 = arith.constant 0 : index
    %c0_0 = arith.constant 0 : index
    %0 = vector.load %arg1[%c0, %c0_0] : memref<2x128xf32, #tpu.memory_space<vmem>>, vector<2x128xf32>
    %cst = arith.constant dense<0xFF800000> : vector<128xf32>
    %1 = vector.multi_reduction <maximumf>, %0, %cst [0] : vector<2x128xf32> to vector<128xf32>
    %2 = vector.shape_cast %1 : vector<128xf32> to vector<1x128xf32>
    %c0_1 = arith.constant 0 : index
    %c0_2 = arith.constant 0 : index
    %3 = vector.load %arg2[%c0_1, %c0_2] : memref<1x128xf32, #tpu.memory_space<vmem>>, vector<1x128xf32>
    tpu.vector_store %arg2[%c0_1, %c0_2], %2 {strides = array<i32>} : memref<1x128xf32, #tpu.memory_space<vmem>>, vector<1x128xf32>,
    return
  }
  func.func @transform_0(%arg0: i32) -> (i32, i32) {
    %c0_i32 = arith.constant 0 : i32
    %c0_i32_0 = arith.constant 0 : i32
    %c0_i32_1 = arith.constant 0 : i32
    return %c0_i32, %c0_i32_0 : i32, i32
  }
  func.func @transform_1(%arg0: i32) -> (i32, i32) {
    %c0_i32 = arith.constant 0 : i32
    %c0_i32_0 = arith.constant 0 : i32
    %c0_i32_1 = arith.constant 0 : i32
    return %c0_i32, %c0_i32_0 : i32, i32
  }
}

module attributes {stable_mosaic.version = 11 : i64} {
  func.func @_pointwise_chain_mean_kernel(%arg0: i32, %arg1: i32, %arg2: memref<1x16x128xbf16, #tpu.memory_space<vmem>>, %arg3: memref<128x128xbf16, #tpu.memory_space<vmem>>, %arg4: memref<1x128xf32, #tpu.memory_space<vmem>>, %arg5: memref<128x128xbf16, #tpu.memory_space<vmem>>, %arg6: memref<1x128xf32, #tpu.memory_space<vmem>>, %arg7: memref<128x128xbf16, #tpu.memory_space<vmem>>, %arg8: memref<1x128xf32, #tpu.memory_space<vmem>>, %arg9: memref<128x128xbf16, #tpu.memory_space<vmem>>, %arg10: memref<1x128xf32, #tpu.memory_space<vmem>>, %arg11: memref<128x128xbf16, #tpu.memory_space<vmem>>, %arg12: memref<1x128xf32, #tpu.memory_space<vmem>>, %arg13: memref<1x1x128xf32, #tpu.memory_space<vmem>>, %arg14: memref<1x128xf32, #tpu.memory_space<vmem>>) attributes {dimension_semantics = [#tpu.dimension_semantics<parallel>, #tpu.dimension_semantics<arbitrary>], iteration_bounds = array<i64: 2, 1>, scalar_prefetch = 0 : i64, scratch_operands = 1 : i64, tpu.core_type = #tpu.core_type<tc>, window_params = [{transform_indices = @transform_0, window_bounds = array<i64: 1, 16, 128>}, {pipeline_mode = #tpu.pipeline_mode<synchronous>, transform_indices = @transform_1, window_bounds = array<i64: 128, 128>}, {pipeline_mode = #tpu.pipeline_mode<synchronous>, transform_indices = @transform_2, window_bounds = array<i64: 1, 128>}, {pipeline_mode = #tpu.pipeline_mode<synchronous>, transform_indices = @transform_3, window_bounds = array<i64: 128, 128>}, {pipeline_mode = #tpu.pipeline_mode<synchronous>, transform_indices = @transform_4, window_bounds = array<i64: 1, 128>}, {pipeline_mode = #tpu.pipeline_mode<synchronous>, transform_indices = @transform_5, window_bounds = array<i64: 128, 128>}, {pipeline_mode = #tpu.pipeline_mode<synchronous>, transform_indices = @transform_6, window_bounds = array<i64: 1, 128>}, {pipeline_mode = #tpu.pipeline_mode<synchronous>, transform_indices = @transform_7, window_bounds = array<i64: 128, 128>}, {pipeline_mode = #tpu.pipeline_mode<synchronous>, transform_indices = @transform_8, window_bounds = array<i64: 1, 128>}, {pipeline_mode = #tpu.pipeline_mode<synchronous>, transform_indices = @transform_9, window_bounds = array<i64: 128, 128>}, {pipeline_mode = #tpu.pipeline_mode<synchronous>, transform_indices = @transform_10, window_bounds = array<i64: 1, 128>}, {transform_indices = @transform_11, window_bounds = array<i64: 1, 1, 128>}]} {
    %c0_i32 = arith.constant 0 : i32
    %0 = arith.cmpi eq, %arg1, %c0_i32 : i32
    %1 = arith.extui %0 : i1 to i32
    %c0_i32_0 = arith.constant 0 : i32
    %2 = arith.cmpi ne, %1, %c0_i32_0 : i32
    scf.if %2 {
      %cst_40 = arith.constant 0.000000e+00 : f32
      %62 = vector.broadcast %cst_40 : f32 to vector<1x128xf32>
      %c0_41 = arith.constant 0 : index
      %c0_42 = arith.constant 0 : index
      %63 = vector.load %arg14[%c0_41, %c0_42] : memref<1x128xf32, #tpu.memory_space<vmem>>, vector<1x128xf32>
      tpu.vector_store %arg14[%c0_41, %c0_42], %62 {strides = array<i32>} : memref<1x128xf32, #tpu.memory_space<vmem>>, vector<1x128xf32>,
    } else {
    }
    %c0 = arith.constant 0 : index
    %c0_1 = arith.constant 0 : index
    %c0_2 = arith.constant 0 : index
    %3 = vector.load %arg2[%c0, %c0_1, %c0_2] : memref<1x16x128xbf16, #tpu.memory_space<vmem>>, vector<1x16x128xbf16>
    %4 = vector.shape_cast %3 : vector<1x16x128xbf16> to vector<16x128xbf16>
    %c0_3 = arith.constant 0 : index
    %c0_4 = arith.constant 0 : index
    %5 = vector.load %arg3[%c0_3, %c0_4] : memref<128x128xbf16, #tpu.memory_space<vmem>>, vector<128x128xbf16>
    %cst = arith.constant dense<0.000000e+00> : vector<16x128xf32>
    %6 = tpu.matmul %4, %5, %cst {dimension_numbers = #tpu.dot_dimension_numbers<[1], [0], [0], [1], [0, 0, 1, 1], [], []>} : vector<16x128xbf16>, vector<128x128xbf16>, vector<16x128xf32> -> vector<16x128xf32>
    %c0_5 = arith.constant 0 : index
    %c0_6 = arith.constant 0 : index
    %7 = vector.load %arg4[%c0_5, %c0_6] : memref<1x128xf32, #tpu.memory_space<vmem>>, vector<1x128xf32>
    %8 = vector.broadcast %7 : vector<1x128xf32> to vector<16x128xf32>
    %9 = arith.addf %6, %8 : vector<16x128xf32>
    %cst_7 = arith.constant 0.000000e+00 : f32
    %10 = vector.broadcast %cst_7 : f32 to vector<16x128xf32>
    %11 = arith.maximumf %9, %10 : vector<16x128xf32>
    %c0_8 = arith.constant 0 : index
    %c0_9 = arith.constant 0 : index
    %12 = vector.load %arg5[%c0_8, %c0_9] : memref<128x128xbf16, #tpu.memory_space<vmem>>, vector<128x128xbf16>
    %cst_10 = arith.constant dense<0.000000e+00> : vector<16x128xf32>
    %13 = tpu.matmul %4, %12, %cst_10 {dimension_numbers = #tpu.dot_dimension_numbers<[1], [0], [0], [1], [0, 0, 1, 1], [], []>} : vector<16x128xbf16>, vector<128x128xbf16>, vector<16x128xf32> -> vector<16x128xf32>
    %c0_11 = arith.constant 0 : index
    %c0_12 = arith.constant 0 : index
    %14 = vector.load %arg6[%c0_11, %c0_12] : memref<1x128xf32, #tpu.memory_space<vmem>>, vector<1x128xf32>
    %15 = vector.broadcast %14 : vector<1x128xf32> to vector<16x128xf32>
    %16 = arith.addf %13, %15 : vector<16x128xf32>
    %cst_13 = arith.constant 0.000000e+00 : f32
    %17 = vector.broadcast %cst_13 : f32 to vector<16x128xf32>
    %18 = arith.maximumf %16, %17 : vector<16x128xf32>
    %19 = arith.addf %11, %18 : vector<16x128xf32>
    %20 = arith.truncf %19 : vector<16x128xf32> to vector<16x128xbf16>
    %c0_14 = arith.constant 0 : index
    %c0_15 = arith.constant 0 : index
    %21 = vector.load %arg7[%c0_14, %c0_15] : memref<128x128xbf16, #tpu.memory_space<vmem>>, vector<128x128xbf16>
    %cst_16 = arith.constant dense<0.000000e+00> : vector<16x128xf32>
    %22 = tpu.matmul %20, %21, %cst_16 {dimension_numbers = #tpu.dot_dimension_numbers<[1], [0], [0], [1], [0, 0, 1, 1], [], []>} : vector<16x128xbf16>, vector<128x128xbf16>, vector<16x128xf32> -> vector<16x128xf32>
    %c0_17 = arith.constant 0 : index
    %c0_18 = arith.constant 0 : index
    %23 = vector.load %arg8[%c0_17, %c0_18] : memref<1x128xf32, #tpu.memory_space<vmem>>, vector<1x128xf32>
    %24 = vector.broadcast %23 : vector<1x128xf32> to vector<16x128xf32>
    %25 = arith.addf %22, %24 : vector<16x128xf32>
    %cst_19 = arith.constant 0.000000e+00 : f32
    %26 = vector.broadcast %cst_19 : f32 to vector<16x128xf32>
    %27 = arith.maximumf %25, %26 : vector<16x128xf32>
    %28 = arith.truncf %27 : vector<16x128xf32> to vector<16x128xbf16>
    %c0_20 = arith.constant 0 : index
    %c0_21 = arith.constant 0 : index
    %29 = vector.load %arg9[%c0_20, %c0_21] : memref<128x128xbf16, #tpu.memory_space<vmem>>, vector<128x128xbf16>
    %cst_22 = arith.constant dense<0.000000e+00> : vector<16x128xf32>
    %30 = tpu.matmul %28, %29, %cst_22 {dimension_numbers = #tpu.dot_dimension_numbers<[1], [0], [0], [1], [0, 0, 1, 1], [], []>} : vector<16x128xbf16>, vector<128x128xbf16>, vector<16x128xf32> -> vector<16x128xf32>
    %c0_23 = arith.constant 0 : index
    %c0_24 = arith.constant 0 : index
    %31 = vector.load %arg10[%c0_23, %c0_24] : memref<1x128xf32, #tpu.memory_space<vmem>>, vector<1x128xf32>
    %32 = vector.broadcast %31 : vector<1x128xf32> to vector<16x128xf32>
    %33 = arith.addf %30, %32 : vector<16x128xf32>
    %cst_25 = arith.constant 0.000000e+00 : f32
    %34 = vector.broadcast %cst_25 : f32 to vector<16x128xf32>
    %35 = arith.maximumf %33, %34 : vector<16x128xf32>
    %36 = arith.truncf %35 : vector<16x128xf32> to vector<16x128xbf16>
    %c0_26 = arith.constant 0 : index
    %c0_27 = arith.constant 0 : index
    %37 = vector.load %arg11[%c0_26, %c0_27] : memref<128x128xbf16, #tpu.memory_space<vmem>>, vector<128x128xbf16>
    %cst_28 = arith.constant dense<0.000000e+00> : vector<16x128xf32>
    %38 = tpu.matmul %36, %37, %cst_28 {dimension_numbers = #tpu.dot_dimension_numbers<[1], [0], [0], [1], [0, 0, 1, 1], [], []>} : vector<16x128xbf16>, vector<128x128xbf16>, vector<16x128xf32> -> vector<16x128xf32>
    %c0_29 = arith.constant 0 : index
    %c0_30 = arith.constant 0 : index
    %39 = vector.load %arg12[%c0_29, %c0_30] : memref<1x128xf32, #tpu.memory_space<vmem>>, vector<1x128xf32>
    %40 = vector.broadcast %39 : vector<1x128xf32> to vector<16x128xf32>
    %41 = arith.addf %38, %40 : vector<16x128xf32>
    %cst_31 = arith.constant 0.000000e+00 : f32
    %42 = vector.broadcast %cst_31 : f32 to vector<16x128xf32>
    %43 = arith.maximumf %41, %42 : vector<16x128xf32>
    %c16_i32 = arith.constant 16 : i32
    %44 = arith.muli %arg1, %c16_i32 : i32
    %45 = tpu.iota {dimensions = array<i32: 0>} : vector<16x1xi32>
    %46 = vector.broadcast %44 : i32 to vector<16x1xi32>
    %47 = arith.addi %46, %45 : vector<16x1xi32>
    %c16_i32_32 = arith.constant 16 : i32
    %48 = vector.broadcast %c16_i32_32 : i32 to vector<16x1xi32>
    %49 = arith.cmpi slt, %47, %48 : vector<16x1xi32>
    %50 = arith.extui %49 : vector<16x1xi1> to vector<16x1xi32>
    %51 = arith.sitofp %50 : vector<16x1xi32> to vector<16x1xf32>
    %c0_33 = arith.constant 0 : index
    %c0_34 = arith.constant 0 : index
    %52 = vector.load %arg14[%c0_33, %c0_34] : memref<1x128xf32, #tpu.memory_space<vmem>>, vector<1x128xf32>
    %53 = vector.broadcast %51 : vector<16x1xf32> to vector<16x128xf32>
    %54 = arith.mulf %43, %53 : vector<16x128xf32>
    %cst_35 = arith.constant dense<0.000000e+00> : vector<128xf32>
    %55 = vector.multi_reduction <add>, %54, %cst_35 [0] : vector<16x128xf32> to vector<128xf32>
    %56 = vector.shape_cast %55 : vector<128xf32> to vector<1x128xf32>
    %57 = arith.addf %52, %56 : vector<1x128xf32>
    %c0_36 = arith.constant 0 : index
    %c0_37 = arith.constant 0 : index
    %58 = vector.load %arg14[%c0_36, %c0_37] : memref<1x128xf32, #tpu.memory_space<vmem>>, vector<1x128xf32>
    tpu.vector_store %arg14[%c0_36, %c0_37], %57 {strides = array<i32>} : memref<1x128xf32, #tpu.memory_space<vmem>>, vector<1x128xf32>,
    %c0_i32_38 = arith.constant 0 : i32
    %59 = arith.cmpi eq, %arg1, %c0_i32_38 : i32
    %60 = arith.extui %59 : i1 to i32
    %c0_i32_39 = arith.constant 0 : i32
    %61 = arith.cmpi ne, %60, %c0_i32_39 : i32
    scf.if %61 {
      %c0_40 = arith.constant 0 : index
      %c0_41 = arith.constant 0 : index
      %62 = vector.load %arg14[%c0_40, %c0_41] : memref<1x128xf32, #tpu.memory_space<vmem>>, vector<1x128xf32>
      %cst_42 = arith.constant 6.250000e-02 : f32
      %63 = vector.broadcast %cst_42 : f32 to vector<1x128xf32>
      %64 = arith.mulf %62, %63 : vector<1x128xf32>
      %c0_43 = arith.constant 0 : index
      %c0_44 = arith.constant 0 : index
      %c0_45 = arith.constant 0 : index
      %65 = vector.load %arg13[%c0_43, %c0_44, %c0_45] : memref<1x1x128xf32, #tpu.memory_space<vmem>>, vector<1x1x128xf32>
      %66 = vector.shape_cast %65 : vector<1x1x128xf32> to vector<1x128xf32>
      %67 = vector.shape_cast %64 : vector<1x128xf32> to vector<1x1x128xf32>
      tpu.vector_store %arg13[%c0_43, %c0_44, %c0_45], %67 {strides = array<i32>} : memref<1x1x128xf32, #tpu.memory_space<vmem>>, vector<1x1x128xf32>,
    } else {
    }
    return
  }
  func.func @transform_0(%arg0: i32, %arg1: i32) -> (i32, i32, i32) {
    %c0_i32 = arith.constant 0 : i32
    %c0_i32_0 = arith.constant 0 : i32
    return %arg0, %arg1, %c0_i32 : i32, i32, i32
  }
  func.func @transform_1(%arg0: i32, %arg1: i32) -> (i32, i32) {
    %c0_i32 = arith.constant 0 : i32
    %c0_i32_0 = arith.constant 0 : i32
    %c0_i32_1 = arith.constant 0 : i32
    return %c0_i32, %c0_i32_0 : i32, i32
  }
  func.func @transform_2(%arg0: i32, %arg1: i32) -> (i32, i32) {
    %c0_i32 = arith.constant 0 : i32
    %c0_i32_0 = arith.constant 0 : i32
    %c0_i32_1 = arith.constant 0 : i32
    return %c0_i32, %c0_i32_0 : i32, i32
  }
  func.func @transform_3(%arg0: i32, %arg1: i32) -> (i32, i32) {
    %c0_i32 = arith.constant 0 : i32
    %c0_i32_0 = arith.constant 0 : i32
    %c0_i32_1 = arith.constant 0 : i32
    return %c0_i32, %c0_i32_0 : i32, i32
  }
  func.func @transform_4(%arg0: i32, %arg1: i32) -> (i32, i32) {
    %c0_i32 = arith.constant 0 : i32
    %c0_i32_0 = arith.constant 0 : i32
    %c0_i32_1 = arith.constant 0 : i32
    return %c0_i32, %c0_i32_0 : i32, i32
  }
  func.func @transform_5(%arg0: i32, %arg1: i32) -> (i32, i32) {
    %c0_i32 = arith.constant 0 : i32
    %c0_i32_0 = arith.constant 0 : i32
    %c0_i32_1 = arith.constant 0 : i32
    return %c0_i32, %c0_i32_0 : i32, i32
  }
  func.func @transform_6(%arg0: i32, %arg1: i32) -> (i32, i32) {
    %c0_i32 = arith.constant 0 : i32
    %c0_i32_0 = arith.constant 0 : i32
    %c0_i32_1 = arith.constant 0 : i32
    return %c0_i32, %c0_i32_0 : i32, i32
  }
  func.func @transform_7(%arg0: i32, %arg1: i32) -> (i32, i32) {
    %c0_i32 = arith.constant 0 : i32
    %c0_i32_0 = arith.constant 0 : i32
    %c0_i32_1 = arith.constant 0 : i32
    return %c0_i32, %c0_i32_0 : i32, i32
  }
  func.func @transform_8(%arg0: i32, %arg1: i32) -> (i32, i32) {
    %c0_i32 = arith.constant 0 : i32
    %c0_i32_0 = arith.constant 0 : i32
    %c0_i32_1 = arith.constant 0 : i32
    return %c0_i32, %c0_i32_0 : i32, i32
  }
  func.func @transform_9(%arg0: i32, %arg1: i32) -> (i32, i32) {
    %c0_i32 = arith.constant 0 : i32
    %c0_i32_0 = arith.constant 0 : i32
    %c0_i32_1 = arith.constant 0 : i32
    return %c0_i32, %c0_i32_0 : i32, i32
  }
  func.func @transform_10(%arg0: i32, %arg1: i32) -> (i32, i32) {
    %c0_i32 = arith.constant 0 : i32
    %c0_i32_0 = arith.constant 0 : i32
    %c0_i32_1 = arith.constant 0 : i32
    return %c0_i32, %c0_i32_0 : i32, i32
  }
  func.func @transform_11(%arg0: i32, %arg1: i32) -> (i32, i32, i32) {
    %c0_i32 = arith.constant 0 : i32
    %c0_i32_0 = arith.constant 0 : i32
    %c0_i32_1 = arith.constant 0 : i32
    return %arg0, %c0_i32, %c0_i32_0 : i32, i32, i32
  }
}

</mosaic_0001>

<bundles_post_ra>
// kernel: efficient_face_temporal_forward.5
= control target key start
LH: loop header
LB: loop body
LE: loop exit
PB: predicated region body
PF: predicated region fallthrough
CT: control target
= control target key end

     0   :  { %vm10_vm0 = vcmask 1041408   ;;  %s84_s0 = inlined_call_operand.vmem [shape: f32[2,128], index: 0, kind: input, shape index: {}]   ;;  %s85_s1 = inlined_call_operand.hbm [shape: f32[1,128], index: 1, kind: output, shape index: {}]  }
   0x1   :  { %v9_v0 = vld [vmem:[%s84_s0] sm:$0x3] }
   0x2   :  { %6 = vsyncpa [#allocation3], 0  ;;  %v11_v1 = vsel %vm10_vm0, %v9_v0, -inf  ;;  %s58_s8 = smov [#allocation2]  }
   0x3   :  { %v12_v2 = vrot.slane %v11_v1, 4  ;;  %s25_s9 = sshll.u32 %s58_s8, 4  ;;  %s26_s9 = int_to_ptr.vmem [resolvable:$true] %s25_s9 }
   0x4   :  { %s34_s10 = scalar_lea.vmem %s26_s9, 16  ;;  %s38_s11 = scalar_lea.vmem %s26_s9, 32 }
   0x5   :  { %v13_v3 = vmax.f32 %v11_v1, %v12_v2  ;;  %p35_p0 = scmp.ne.s32.totalorder %s26_s9, %s34_s10  ;;  %p39_p1 = scmp.lt.s32.totalorder %s26_s9, %s26_s9 }
   0x6   :  { %p40_p2 = scmp.lt.s32.totalorder %s38_s11, %s34_s10 }
   0x7   :  { %v14_v4 = vrot.slane %v13_v3, 2 }
   0x8   :  { %p41_p3 = por %p40_p2, %p39_p1 }
   0x9   :  { %v15_v5 = vmax.f32 %v13_v3, %v14_v4 }
   0xa   :  { %p42_p4 = pnand %p41_p3, %p35_p0 }
   0xb   :  { %v16_v6 = vrot.slane %v15_v5, 1 }
   0xd   :  { %v17_v7 = vmax.f32 %v15_v5, %v16_v6 }
   0xf   :  { %18 = vst [vmem:[#allocation2] sm:$0x1] %v17_v7 }
  0x10   :  { %45 = shalt.err (!%p42_p4)
}
  0x11   :  { %s46_s13 = scalar_lea.hbm %s85_s1, 16 }
  0x12   :  { %p47_p5 = scmp.ne.s32.totalorder %s85_s1, %s46_s13  ;;  %p50_p6 = scmp.lt.u32.totalorder %s46_s13, %s85_s1 }
  0x14   :  { %p52_p7 = pnand %p50_p6, %p47_p5 }
  0x16   :  { %55 = shalt.err (!%p52_p7)
}
  0x17   :  { %28 = dma.vmem_to_hbm [thread:$0]  %s26_s9, 16, %s85_s1, [#allocation3]  }
  0x18   :  { %56 = dma.done.wait [#allocation3], 16  }
  0x19   :  { %57 = vsyncadd [#allocation3], 4294967280 }
  0x1a   :  { %32 = vsyncpa [#allocation3], 1 }

// kernel: efficient_face_temporal_forward.3
= control target key start
LH: loop header
LB: loop body
LE: loop exit
PB: predicated region body
PF: predicated region fallthrough
CT: control target
= control target key end

     0   :  { %s704_s15 = smov 0   ;;  %s706_s16 = smov 0   ;;  %s781_s0 = inlined_call_operand.vmem [shape: bf16[2,64,32], index: 0, kind: input, shape index: {}, may-alias: {0,1}]   ;;  %s782_s1 = inlined_call_operand.vmem [shape: bf16[2,64,32], index: 1, kind: input, shape index: {}, may-alias: {0,1}]   ;;  %s783_s2 = inlined_call_operand.vmem [shape: bf16[32,128], index: 2, kind: input, shape index: {}]   ;;  %s784_s3 = inlined_call_operand.vmem [shape: f32[1,128], index: 3, kind: input, shape index: {}]   ;;  %s785_s4 = inlined_call_operand.vmem [shape: bf16[2,4,4,128], index: 4, kind: output, shape index: {}]  }
   0x1   :  { %s708_s17 = smov 0   ;;  %s710_s18 = smov 0  }
   0x2   :  { %s712_s19 = smov 0  }
   0x3 LB: > { %s23_s20 = sadd.s32 1, %s667_s17  ;;  %s26_s21 = sadd.s32 1, %s671_s18  ;;  %s675_s19 = sphi %s712_s19, %s14_s19   ;;  %s671_s18 = sphi %s710_s18, %s789_s18   ;;  %s667_s17 = sphi %s708_s17, %s788_s17   ;;  %s663_s16 = sphi %s706_s16, %s787_s16   ;;  %s659_s15 = sphi %s704_s15, %s786_s15  }
   0x4   : > { %p24_p0 = scmp.ge.s32.totalorder %s23_s20, 4  ;;  %p545_p1 = scmp.ge.s32.totalorder %s675_s19, 1 }
   0x5   : > { %p214_p2 = scmp.lt.s32.totalorder %s675_s19, 9 }
   0x6   : > { %s791_s20 = smov (%p24_p0, %s23_s20), 0  ;;  %s793_s21 = smov (!%p24_p0, %s26_s21), %s671_s18 }
   0x7   : > { %p215_p3 = pnand %p545_p1, %p214_p2  ;;  %p28_p4 = scmp.ge.s32.totalorder %s793_s21, 2 }
   0x8   : > { %v634_v0 = vld [vmem:[%s783_s2] sm:$0xff] (!%p215_p3)   ;;  %v677_v1 = vmov (!%p215_p3), 0.0   ;;  %v635_v2 = vld [vmem:[%s783_s2 + $0x8] sm:$0xff] (!%p215_p3)   ;;  %s546_s26 = sshll.u32 (!%p215_p3), %s659_s15, 1  ;;  %p260_p5 = scmp.lt.s32.totalorder (!%p215_p3), %s663_s16, 1  ;;  %vm678_vm0 = vmmov (!%p215_p3), 0  }
   0x9   : > { %s795_s21 = smov (%p28_p4, %s793_s21), 0  ;;  %218 = sbr.rel (%p215_p3) target bundleno = 257 (0x101), region = 36 }
   0xa   : > { %576 = vmatprep.subr.bf16.mxu0 (!%p215_p3), %v677_v1  ;;  %423 = vst [vmem:[#allocation2] sm:$0x1] (!%p215_p3), %v677_v1  ;;  %584 = vmatprep.subr.bf16.mxu1 (!%p215_p3), %v677_v1  ;;  %p262_p6 = scmp.lt.s32.totalorder (!%p215_p3), %s546_s26, 7  ;;  %s550_s27 = sadd.s32 (!%p215_p3), 4294967295, %s546_s26  ;;  %vm324_vm1 = vcmask (!%p215_p3), 261120  }
   0xb   : > { %577 = vmatpush3.bf16.msra.mxu0 (!%p215_p3), %v634_v0  ;;  %585 = vmatpush3.bf16.msra.mxu1 (!%p215_p3), %v634_v0  ;;  %p271_p7 = scmp.gt.s32.totalorder (!%p215_p3), %s550_s27, 0  ;;  %p551_p8 = scmp.lt.s32.totalorder (!%p215_p3), %s550_s27, 7  ;;  %v560_v5 = vld [vmem:[%s784_s3] ss:$0 sm:$0xff] (!%p215_p3) }
   0xc   : > { %578 = vmatprep.subr.bf16.mxu0 (!%p215_p3), %v677_v1  ;;  %586 = vmatprep.subr.bf16.mxu1 (!%p215_p3), %v677_v1  ;;  %p416_p9 = scmp.gt.s32.totalorder (!%p215_p3), %s659_s15, 0  ;;  %p287_p10 = scmp.lt.s32.totalorder (!%p215_p3), %s659_s15, 3 }
   0xd   : > { %580 = vmatprep.mubr.msk.bf16.mxu0 (!%p215_p3), %vm678_vm0, %v677_v1  ;;  %588 = vmatprep.mubr.msk.bf16.mxu1 (!%p215_p3), %vm678_vm0, %v677_v1 }
   0xf   : > { %579 = vmatpush3.bf16.msra.mxu0 (!%p215_p3), %v635_v2  ;;  %587 = vmatpush3.bf16.msra.mxu1 (!%p215_p3), %v635_v2 }
  0x10   : > { %s797_s16 = smov (!%p260_p5, %s663_s16), 1  ;;  %s799_s26 = smov (!%p262_p6, %s546_s26), 7 }
  0x11   : > { %s547_s28 = sshll.u32 %s797_s16, 3  ;;  %s801_s27 = smov (!%p271_p7, %s550_s27), 0 }
  0x12   : > { %s265_s29 = sadd.s32 %s547_s28, %s799_s26  ;;  %s803_s27 = smov (!%p551_p8, %s801_s27), 7 }
  0x13   : > { %s548_s30 = sshll.u32 %s265_s29, 2  ;;  %s278_s8 = sadd.s32 %s803_s27, %s547_s28 }
  0x14   : > { %s267_s7 = scalar_lea.vmem %s781_s0, %s548_s30  ;;  %s557_s9 = sshll.u32 %s278_s8, 2 }
  0x15   : > { %v636_v3 = vld [vmem:[%s267_s7] sm:$0xff]   ;;  %s280_s12 = scalar_lea.vmem %s782_s1, %s557_s9  ;;  %s805_s15 = smov (!%p287_p10, %s659_s15), 3 }
  0x16   : > { %581 = vmatmul.mubr.msk.bf16.vlgmr.msra.gmra.mrb[0].mxu0 %vm324_vm1, %v636_v3  ;;  %v371_v4 = vld [vmem:[%s280_s12] sm:$0xf]  ;;  %s417_s22 = scalar_select %p416_p9, 1, 0 }
  0x17   : > { %589 = vmatmul.mubr.msk.bf16.vlgmr.msra.gmra.mrb[0].mxu1 %vm324_vm1, %v371_v4  ;;  %s558_s24 = sshll.u32 %s797_s16, 2 }
  0x18   : > { %s418_s23 = scvt.s32.f32 %s417_s22  ;;  %s290_s25 = sadd.s32 %s558_s24, %s805_s15 }
  0x19   : > { %s559_s26 = sshll.u32 %s290_s25, 1 }
  0x1a   : > { %v419_v18 = vstv %s418_s23  ;;  %s292_s29 = scalar_lea.vmem %s785_s4, %s559_s26 }
  0xe9   : > { %v362_v6 = vpop.f32.mrb[0].mxu0 }
  0xea   : > { %v363_v7 = vadd.f32 %v560_v5, %v362_v6  ;;  %v582_v8 = vpop.f32.mrb[1].mxu0  ;;  %v409_v14 = vpop.f32.mrb[0].mxu1 }
  0xeb   : > { %v365_v9 = vpop.f32.mrb[2].mxu0  ;;  %v410_v15 = vadd.f32 %v560_v5, %v409_v14  ;;  %v590_v17 = vpop.f32.mrb[1].mxu1 }
  0xec   : > { %v366_v10 = vadd.f32 %v560_v5, %v365_v9  ;;  %v583_v11 = vpop.f32.mrb[3].mxu0  ;;  %v369_v12 = vmax.f32 %v363_v7, 0.0  ;;  %v412_v19 = vpop.f32.mrb[2].mxu1 }
  0xed   : > { %v415_v20 = vmax.f32 %v410_v15, 0.0  ;;  %v591_v21 = vpop.f32.mrb[3].mxu1 }
  0xee   : > { %v370_v13 = vmax.f32 %v366_v10, 0.0 }
  0xef   : > { %v420_v22 = vmul.f32 %v419_v18, %v415_v20 }
  0xf0   : > { %v421_v16 = vmax.f32 %v369_v12, %v370_v13 }
  0xf2   : > { %v422_v23 = vmax.f32 %v420_v22, %v421_v16 }
  0xf4   : > { %424 = vst [vmem:[#allocation2 - $0x3] sm:$0x70] %v422_v23  ;;  %v426_v24 = vrot.slane %v422_v23, 4 }
  0xf6   : > { %v428_v25 = vmax.f32 %v422_v23, %v426_v24 }
  0xfb   : > { %v429_v26 = vld [vmem:[#allocation2] sm:$0xf] }
  0xfc   : > { %v430_v27 = vmax.f32 %v428_v25, %v429_v26 }
  0xfe   : > { %v431_v28 = vpack.c.bf16 %v430_v27, %v430_v27 }
 0x100   : > { %432 = vst [vmem:[%s292_s29] sm:$0x3] %v431_v28 }
 0x101 PF: > { %s14_s19 = sadd.s32 1, %s675_s19   ;;  %s786_s15 = smov %s667_s17 }
 0x102   : > { %p11_p11 = scmp.ge.s32.totalorder %s14_s19, 10   ;;  %s787_s16 = smov %s671_s18 }
 0x103   : > { %s788_s17 = smov %s791_s20  ;;  %s789_s18 = smov %s795_s21 }
 0x104   :  { %13 = sbr.rel (!%p11_p11) target bundleno = 3 (0x3), region = 69 }

// kernel: efficient_face_temporal_forward.4
= control target key start
LH: loop header
LB: loop body
LE: loop exit
PB: predicated region body
PF: predicated region fallthrough
CT: control target
= control target key end

     0   :  { %s1446_s17 = smov 0   ;;  %s1448_s18 = smov 0   ;;  %s1673_s0 = inlined_call_operand.vmem [shape: bf16[2,16,128], index: 0, kind: input, shape index: {}]   ;;  %s1674_s1 = inlined_call_operand.vmem [shape: bf16[128,128], index: 1, kind: input, shape index: {}]   ;;  %s1675_s2 = inlined_call_operand.vmem [shape: f32[1,128], index: 2, kind: input, shape index: {}]   ;;  %s1676_s3 = inlined_call_operand.vmem [shape: bf16[128,128], index: 3, kind: input, shape index: {}]   ;;  %s1677_s4 = inlined_call_operand.vmem [shape: f32[1,128], index: 4, kind: input, shape index: {}]   ;;  %s1678_s5 = inlined_call_operand.vmem [shape: bf16[128,128], index: 5, kind: input, shape index: {}]   ;;  %s1679_s6 = inlined_call_operand.vmem [shape: f32[1,128], index: 6, kind: input, shape index: {}]   ;;  %s1680_s7 = inlined_call_operand.vmem [shape: bf16[128,128], index: 7, kind: input, shape index: {}]   ;;  %s1681_s8 = inlined_call_operand.vmem [shape: f32[1,128], index: 8, kind: input, shape index: {}]   ;;  %s1682_s9 = inlined_call_operand.vmem [shape: bf16[128,128], index: 9, kind: input, shape index: {}]   ;;  %s1683_s10 = inlined_call_operand.vmem [shape: f32[1,128], index: 10, kind: input, shape index: {}]   ;;  %s1684_s11 = inlined_call_operand.vmem [shape: f32[2,1,128], index: 11, kind: output, shape index: {}]  }
   0x1   :  { %s1450_s19 = smov 0  }
   0x2 LB: > { %s33_s20 = sadd.s32 1, %s1378_s18  ;;  %p1096_p0 = scmp.ge.s32.totalorder %s1382_s19, 1  ;;  %s1382_s19 = sphi %s1450_s19, %s21_s19   ;;  %s1378_s18 = sphi %s1448_s18, %s1686_s18   ;;  %s1374_s17 = sphi %s1446_s17, %s1685_s17  }
   0x3   : > { %p35_p1 = scmp.ge.s32.totalorder %s33_s20, 2  ;;  %p356_p2 = scmp.lt.s32.totalorder %s1382_s19, 3 }
   0x5   : > { %s1688_s20 = smov (%p35_p1, %s33_s20), 0  ;;  %p357_p3 = pnand %p1096_p0, %p356_p2 }
   0x6   : > { %v1319_v0 = vld [vmem:[%s1674_s1] sm:$0xff] (!%p357_p3)   ;;  %v1384_v1 = vmov (!%p357_p3), 0.0   ;;  %v1321_v3 = vld [vmem:[%s1674_s1 + $0x8] sm:$0xff] (!%p357_p3)   ;;  %vm1385_vm0 = vmmov (!%p357_p3), 0   ;;  %p399_p4 = scmp.lt.s32.totalorder (!%p357_p3), %s1374_s17, 1  ;;  %v1323_v5 = vld [vmem:[%s1674_s1 + $0x10] sm:$0xff] (!%p357_p3)  }
   0x7   : > { %360 = sbr.rel (%p357_p3) target bundleno = 947 (0x3b3), region = 64  ;;  %1193 = vmatprep.subr.bf16.mxu0 (!%p357_p3), %v1384_v1  ;;  %416 = vst [vmem:[#allocation2] sm:$0x1] (!%p357_p3), %v1384_v1  ;;  %1213 = vmatprep.subr.bf16.mxu1 (!%p357_p3), %v1384_v1  ;;  %v1320_v2 = vld [vmem:[%s1676_s3] sm:$0xff] (!%p357_p3)   ;;  %v1322_v4 = vld [vmem:[%s1676_s3 + $0x8] sm:$0xff] (!%p357_p3)   ;;  %v1324_v6 = vld [vmem:[%s1676_s3 + $0x10] sm:$0xff] (!%p357_p3)  }
   0x8   : > { %1194 = vmatpush3.bf16.msra.mxu0 (!%p357_p3), %v1319_v0  ;;  %1209 = vmatprep.mubr.msk.bf16.mxu0 (!%p357_p3), %vm1385_vm0, %v1384_v1  ;;  %v1325_v7 = vld [vmem:[%s1674_s1 + $0x18] sm:$0xff] (!%p357_p3)   ;;  %v1327_v9 = vld [vmem:[%s1674_s1 + $0x20] sm:$0xff] (!%p357_p3)   ;;  %v1329_v11 = vld [vmem:[%s1674_s1 + $0x28] sm:$0xff] (!%p357_p3)  }
   0x9   : > { %1214 = vmatpush3.bf16.msra.mxu1 (!%p357_p3), %v1320_v2  ;;  %1195 = vmatprep.subr.bf16.mxu0 (!%p357_p3), %v1384_v1  ;;  %v1326_v8 = vld [vmem:[%s1676_s3 + $0x18] sm:$0xff] (!%p357_p3)   ;;  %v1328_v10 = vld [vmem:[%s1676_s3 + $0x20] sm:$0xff] (!%p357_p3)   ;;  %v1330_v12 = vld [vmem:[%s1676_s3 + $0x28] sm:$0xff] (!%p357_p3)  }
   0xa   : > { %1215 = vmatprep.subr.bf16.mxu1 (!%p357_p3), %v1384_v1  ;;  %1229 = vmatprep.mubr.msk.bf16.mxu1 (!%p357_p3), %vm1385_vm0, %v1384_v1  ;;  %v1331_v13 = vld [vmem:[%s1674_s1 + $0x30] sm:$0xff] (!%p357_p3)   ;;  %v1333_v15 = vld [vmem:[%s1674_s1 + $0x38] sm:$0xff] (!%p357_p3)   ;;  %v1336_v18 = vld [vmem:[%s1678_s5] sm:$0xff] (!%p357_p3)  }
   0xb   : > { %v1332_v14 = vld [vmem:[%s1676_s3 + $0x30] sm:$0xff] (!%p357_p3)   ;;  %v1334_v16 = vld [vmem:[%s1676_s3 + $0x38] sm:$0xff] (!%p357_p3)   ;;  %v1337_v19 = vld [vmem:[%s1678_s5 + $0x8] sm:$0xff] (!%p357_p3)  }
   0xc   : > { %1196 = vmatpush3.bf16.msra.mxu0 (!%p357_p3), %v1321_v3  ;;  %v1338_v20 = vld [vmem:[%s1678_s5 + $0x10] sm:$0xff] (!%p357_p3)   ;;  %v1339_v21 = vld [vmem:[%s1678_s5 + $0x18] sm:$0xff] (!%p357_p3)   ;;  %v1340_v22 = vld [vmem:[%s1678_s5 + $0x20] sm:$0xff] (!%p357_p3)  }
   0xd   : > { %1216 = vmatpush3.bf16.msra.mxu1 (!%p357_p3), %v1322_v4  ;;  %1197 = vmatprep.subr.bf16.mxu0 (!%p357_p3), %v1384_v1  ;;  %v1341_v23 = vld [vmem:[%s1678_s5 + $0x28] sm:$0xff] (!%p357_p3)   ;;  %v1342_v24 = vld [vmem:[%s1678_s5 + $0x30] sm:$0xff] (!%p357_p3)   ;;  %v1343_v25 = vld [vmem:[%s1678_s5 + $0x38] sm:$0xff] (!%p357_p3)  }
   0xe   : > { %1217 = vmatprep.subr.bf16.mxu1 %v1384_v1  ;;  %s1690_s17 = smov (!%p399_p4, %s1374_s17), 1  ;;  %v1344_v26 = vld [vmem:[%s1680_s7] sm:$0xff]   ;;  %v1345_v27 = vld [vmem:[%s1680_s7 + $0x8] sm:$0xff]   ;;  %v1346_v28 = vld [vmem:[%s1680_s7 + $0x10] sm:$0xff]  }
   0xf   : > { %s1147_s22 = sshll.u32 %s1690_s17, 3  ;;  %v1347_v29 = vld [vmem:[%s1680_s7 + $0x18] sm:$0xff]   ;;  %v1348_v30 = vld [vmem:[%s1680_s7 + $0x20] sm:$0xff]   ;;  %v1349_v31 = vld [vmem:[%s1680_s7 + $0x28] sm:$0xff]   ;;  %s410_s27 = scalar_lea.vmem %s1684_s11, %s1690_s17 }
  0x10   : > { %1198 = vmatpush3.bf16.msra.mxu0 %v1323_v5  ;;  %s406_s29 = scalar_lea.vmem %s1673_s0, %s1147_s22  ;;  %v1099_v32 = vld [vmem:[%s1675_s2] ss:$0 sm:$0xff]  ;;  %v1350_v53 = vld [vmem:[%s1680_s7 + $0x30] sm:$0xff]   ;;  %v1351_v54 = vld [vmem:[%s1680_s7 + $0x38] sm:$0xff]  }
  0x11   : > { %1218 = vmatpush3.bf16.msra.mxu1 %v1324_v6  ;;  %1199 = vmatprep.subr.bf16.mxu0 %v1384_v1  ;;  %v1335_v17 = vld [vmem:[%s406_s29] sm:$0xff]   ;;  %v1353_v56 = vld [vmem:[%s1682_s9 + $0x8] sm:$0xff]   ;;  %v1354_v57 = vld [vmem:[%s1682_s9 + $0x10] sm:$0xff]  }
  0x12   : > { %1219 = vmatprep.subr.bf16.mxu1 %v1384_v1  ;;  %v1109_v33 = vld [vmem:[%s1677_s4] ss:$0 sm:$0xff]  ;;  %v1355_v58 = vld [vmem:[%s1682_s9 + $0x18] sm:$0xff]   ;;  %v1357_v60 = vld [vmem:[%s1682_s9 + $0x28] sm:$0xff]  }
  0x13   : > { %v1352_v55 = vld [vmem:[%s1682_s9] sm:$0xff]  }
  0x14   : > { %1200 = vmatpush3.bf16.msra.mxu0 %v1325_v7  ;;  %v1356_v59 = vld [vmem:[%s1682_s9 + $0x20] sm:$0xff]  }
  0x15   : > { %1220 = vmatpush3.bf16.msra.mxu1 %v1326_v8  ;;  %1201 = vmatprep.subr.bf16.mxu0 %v1384_v1  ;;  %v1118_v61 = vld [vmem:[%s1679_s6] ss:$0 sm:$0xff]  ;;  %v1358_v8 = vld [vmem:[%s1682_s9 + $0x30] sm:$0xff]  }
  0x16   : > { %1221 = vmatprep.subr.bf16.mxu1 %v1384_v1 }
  0x18   : > { %1202 = vmatpush3.bf16.msra.mxu0 %v1327_v9  ;;  %v1359_v9 = vld [vmem:[%s1682_s9 + $0x38] sm:$0xff]  }
  0x19   : > { %1222 = vmatpush3.bf16.msra.mxu1 %v1328_v10  ;;  %1203 = vmatprep.subr.bf16.mxu0 %v1384_v1  ;;  %v1127_v10 = vld [vmem:[%s1681_s8] ss:$0 sm:$0xff] }
  0x1a   : > { %1223 = vmatprep.subr.bf16.mxu1 %v1384_v1 }
  0x1c   : > { %1204 = vmatpush3.bf16.msra.mxu0 %v1329_v11 }
  0x1d   : > { %1224 = vmatpush3.bf16.msra.mxu1 %v1330_v12  ;;  %1205 = vmatprep.subr.bf16.mxu0 %v1384_v1 }
  0x1e   : > { %1225 = vmatprep.subr.bf16.mxu1 %v1384_v1 }
  0x20   : > { %1206 = vmatpush3.bf16.msra.mxu0 %v1331_v13 }
  0x21   : > { %1226 = vmatpush3.bf16.msra.mxu1 %v1332_v14  ;;  %1207 = vmatprep.subr.bf16.mxu0 %v1384_v1 }
  0x22   : > { %1227 = vmatprep.subr.bf16.mxu1 %v1384_v1 }
  0x24   : > { %1208 = vmatpush3.bf16.msra.mxu0 %v1333_v15 }
  0x25   : > { %1228 = vmatpush3.bf16.msra.mxu1 %v1334_v16  ;;  %1233 = vmatprep.subr.bf16.mxu0 %v1384_v1 }
  0x26   : > { %1253 = vmatprep.subr.bf16.mxu1 %v1384_v1 }
  0x27   : > { %1210 = vmatmul.mubr.bf16.vlgmr.msra.gmra.mrb[0].mxu0 %v1335_v17 }
  0x28   : > { %1230 = vmatmul.mubr.bf16.vlgmr.msra.gmra.mrb[0].mxu1 %v1335_v17  ;;  %1234 = vmatpush3.bf16.msra.mxu0 %v1336_v18 }
  0x29   : > { %1235 = vmatprep.subr.bf16.mxu0 %v1384_v1  ;;  %1249 = vmatprep.mubr.msk.bf16.mxu0 %vm1385_vm0, %v1384_v1 }
  0x2a   : > { %1269 = vmatprep.mubr.msk.bf16.mxu1 %vm1385_vm0, %v1384_v1  ;;  %1254 = vmatpush3.bf16.msra.mxu1 %v1344_v26 }
  0x2b   : > { %1255 = vmatprep.subr.bf16.mxu1 %v1384_v1 }
  0x2c   : > { %1236 = vmatpush3.bf16.msra.mxu0 %v1337_v19 }
  0x2d   : > { %1237 = vmatprep.subr.bf16.mxu0 %v1384_v1 }
  0x2e   : > { %1256 = vmatpush3.bf16.msra.mxu1 %v1345_v27 }
  0x2f   : > { %1257 = vmatprep.subr.bf16.mxu1 %v1384_v1 }
  0x30   : > { %1238 = vmatpush3.bf16.msra.mxu0 %v1338_v20 }
  0x31   : > { %1239 = vmatprep.subr.bf16.mxu0 %v1384_v1 }
  0x32   : > { %1258 = vmatpush3.bf16.msra.mxu1 %v1346_v28 }
  0x33   : > { %1259 = vmatprep.subr.bf16.mxu1 %v1384_v1 }
  0x34   : > { %1240 = vmatpush3.bf16.msra.mxu0 %v1339_v21 }
  0x35   : > { %1241 = vmatprep.subr.bf16.mxu0 %v1384_v1 }
  0x36   : > { %1260 = vmatpush3.bf16.msra.mxu1 %v1347_v29 }
  0x37   : > { %1261 = vmatprep.subr.bf16.mxu1 %v1384_v1 }
  0x38   : > { %1242 = vmatpush3.bf16.msra.mxu0 %v1340_v22 }
  0x39   : > { %1243 = vmatprep.subr.bf16.mxu0 %v1384_v1 }
  0x3a   : > { %1262 = vmatpush3.bf16.msra.mxu1 %v1348_v30 }
  0x3b   : > { %1263 = vmatprep.subr.bf16.mxu1 %v1384_v1 }
  0x3c   : > { %1244 = vmatpush3.bf16.msra.mxu0 %v1341_v23 }
  0x3d   : > { %1245 = vmatprep.subr.bf16.mxu0 %v1384_v1 }
  0x3e   : > { %1264 = vmatpush3.bf16.msra.mxu1 %v1349_v31 }
  0x3f   : > { %1265 = vmatprep.subr.bf16.mxu1 %v1384_v1 }
  0x40   : > { %1246 = vmatpush3.bf16.msra.mxu0 %v1342_v24 }
  0x41   : > { %1247 = vmatprep.subr.bf16.mxu0 %v1384_v1 }
  0x42   : > { %1266 = vmatpush3.bf16.msra.mxu1 %v1350_v53 }
  0x43   : > { %1267 = vmatprep.subr.bf16.mxu1 %v1384_v1 }
  0x44   : > { %1248 = vmatpush3.bf16.msra.mxu0 %v1343_v25 }
  0x45   : > { %1273 = vmatprep.subr.bf16.mxu0 %v1384_v1 }
  0x46   : > { %1268 = vmatpush3.bf16.msra.mxu1 %v1351_v54 }
  0xfa   : > { %v530_v34 = vpop.f32.mrb[0].mxu0 }
  0xfb   : > { %v531_v35 = vadd.f32 %v1099_v32, %v530_v34  ;;  %v644_v36 = vpop.f32.mrb[0].mxu1  ;;  %v1211_v37 = vpop.f32.mrb[1].mxu0  ;;  %v1013_v34 = vld [vmem:[#allocation2] sm:$0x1] }
  0xfc   : > { %v645_v38 = vadd.f32 %v1109_v33, %v644_v36  ;;  %v1231_v39 = vpop.f32.mrb[1].mxu1  ;;  %v533_v40 = vpop.f32.mrb[2].mxu0 }
  0xfd   : > { %v537_v41 = vmax.f32 %v531_v35, 0.0  ;;  %v534_v42 = vadd.f32 %v1099_v32, %v533_v40  ;;  %v647_v43 = vpop.f32.mrb[2].mxu1  ;;  %v1212_v44 = vpop.f32.mrb[3].mxu0 }
  0xfe   : > { %v651_v45 = vmax.f32 %v645_v38, 0.0  ;;  %v648_v46 = vadd.f32 %v1109_v33, %v647_v43  ;;  %v1232_v47 = vpop.f32.mrb[3].mxu1 }
  0xff   : > { %v538_v48 = vmax.f32 %v534_v42, 0.0 }
 0x100   : > { %v653_v49 = vadd.f32 %v651_v45, %v537_v41  ;;  %v652_v50 = vmax.f32 %v648_v46, 0.0 }
 0x102   : > { %v654_v51 = vadd.f32 %v652_v50, %v538_v48 }
 0x104   : > { %v655_v52 = vpack.c.bf16 %v654_v51, %v653_v49 }
 0x106   : > { %1250 = vmatmul.mubr.bf16.vlgmr.msra.gmra.mrb[4].mxu0 %v655_v52 }
 0x107   : > { %1289 = vmatprep.mubr.msk.bf16.mxu0 %vm1385_vm0, %v1384_v1  ;;  %1274 = vmatpush3.bf16.msra.mxu0 %v1352_v55 }
 0x108   : > { %1275 = vmatprep.subr.bf16.mxu0 %v1384_v1 }
 0x10b   : > { %1276 = vmatpush3.bf16.msra.mxu0 %v1353_v56 }
 0x10c   : > { %1277 = vmatprep.subr.bf16.mxu0 %v1384_v1 }
 0x10f   : > { %1278 = vmatpush3.bf16.msra.mxu0 %v1354_v57 }
 0x110   : > { %1279 = vmatprep.subr.bf16.mxu0 %v1384_v1 }
 0x113   : > { %1280 = vmatpush3.bf16.msra.mxu0 %v1355_v58 }
 0x114   : > { %1281 = vmatprep.subr.bf16.mxu0 %v1384_v1 }
 0x117   : > { %1282 = vmatpush3.bf16.msra.mxu0 %v1356_v59 }
 0x118   : > { %1283 = vmatprep.subr.bf16.mxu0 %v1384_v1 }
 0x11b   : > { %1284 = vmatpush3.bf16.msra.mxu0 %v1357_v60 }
 0x11c   : > { %1285 = vmatprep.subr.bf16.mxu0 %v1384_v1 }
 0x11f   : > { %1286 = vmatpush3.bf16.msra.mxu0 %v1358_v8 }
 0x120   : > { %1287 = vmatprep.subr.bf16.mxu0 %v1384_v1  ;;  %v1136_v1 = vld [vmem:[%s1683_s10] ss:$0 sm:$0xff] }
 0x123   : > { %1288 = vmatpush3.bf16.msra.mxu0 %v1359_v9 }
 0x1d9   : > { %v761_v62 = vpop.f32.mrb[4].mxu0 }
 0x1da   : > { %v762_v63 = vadd.f32 %v1118_v61, %v761_v62  ;;  %v1251_v0 = vpop.f32.mrb[5].mxu0 }
 0x1db   : > { %v764_v2 = vpop.f32.mrb[6].mxu0 }
 0x1dc   : > { %v765_v3 = vadd.f32 %v1118_v61, %v764_v2  ;;  %v1252_v4 = vpop.f32.mrb[7].mxu0  ;;  %v768_v5 = vmax.f32 %v762_v63, 0.0 }
 0x1de   : > { %v769_v6 = vmax.f32 %v765_v3, 0.0 }
 0x1e0   : > { %v770_v7 = vpack.c.bf16 %v769_v6, %v768_v5 }
 0x1e2   : > { %1270 = vmatmul.mubr.bf16.vlgmr.msra.gmra.mrb[4].mxu1 %v770_v7 }
 0x2b5   : > { %v876_v11 = vpop.f32.mrb[4].mxu1 }
 0x2b6   : > { %v877_v12 = vadd.f32 %v1127_v10, %v876_v11  ;;  %v1271_v13 = vpop.f32.mrb[5].mxu1 }
 0x2b7   : > { %v879_v14 = vpop.f32.mrb[6].mxu1 }
 0x2b8   : > { %v880_v15 = vadd.f32 %v1127_v10, %v879_v14  ;;  %v1272_v16 = vpop.f32.mrb[7].mxu1  ;;  %v883_v17 = vmax.f32 %v877_v12, 0.0 }
 0x2ba   : > { %v884_v18 = vmax.f32 %v880_v15, 0.0 }
 0x2bc   : > { %v885_v19 = vpack.c.bf16 %v884_v18, %v883_v17 }
 0x2be   : > { %1290 = vmatmul.mubr.bf16.vlgmr.msra.gmra.mrb[8].mxu0 %v885_v19 }
 0x391   : > { %v991_v20 = vpop.f32.mrb[8].mxu0 }
 0x392   : > { %v992_v21 = vadd.f32 %v1136_v1, %v991_v20  ;;  %v1291_v22 = vpop.f32.mrb[9].mxu0 }
 0x393   : > { %v994_v23 = vpop.f32.mrb[10].mxu0 }
 0x394   : > { %v995_v24 = vadd.f32 %v1136_v1, %v994_v23  ;;  %v1292_v25 = vpop.f32.mrb[11].mxu0  ;;  %v998_v26 = vmax.f32 %v992_v21, 0.0 }
 0x396   : > { %v999_v27 = vmax.f32 %v995_v24, 0.0 }
 0x398   : > { %v1016_v28 = vadd.f32 %v999_v27, %v998_v26 }
 0x39a   : > { %v1017_v29 = vrot.slane %v1016_v28, 4 }
 0x39c   : > { %v1018_v30 = vadd.f32 %v1017_v29, %v1016_v28 }
 0x39e   : > { %v1019_v31 = vrot.slane %v1018_v30, 2 }
 0x3a0   : > { %v1020_v32 = vadd.f32 %v1019_v31, %v1018_v30 }
 0x3a2   : > { %v1021_v33 = vrot.slane %v1020_v32, 1 }
 0x3a4   : > { %v1022_v35 = vadd.f32 %v1021_v33, %v1020_v32 }
 0x3a6   : > { %v1023_v36 = vadd.f32 %v1022_v35, %v1013_v34 }
 0x3a8   : > { %1024 = vst [vmem:[#allocation2] sm:$0x1] %v1023_v36 }
 0x3af   : > { %v1028_v37 = vld [vmem:[#allocation2] sm:$0x1] }
 0x3b0   : > { %v1029_v38 = vmul.f32 0.0625, %v1028_v37 }
 0x3b2   : > { %1030 = vst [vmem:[%s410_s27] sm:$0x1] %v1029_v38 }
 0x3b3 PF: > { %s21_s19 = sadd.s32 1, %s1382_s19   ;;  %s1685_s17 = smov %s1378_s18 }
 0x3b4   : > { %p18_p5 = scmp.ge.s32.totalorder %s21_s19, 4   ;;  %s1686_s18 = smov %s1688_s20 }
 0x3b6   :  { %20 = sbr.rel (!%p18_p5) target bundleno = 2 (0x2), region = 102 }

</bundles_post_ra>
